<compile_context>
chip_gen: v6e
topology: v6e:2x2x1
jax: 0.10.0
libtpu: 0.0.40
codegen_flags: <defaults>
</compile_context>

<pallas_src>
import jax
import jax.numpy as jnp
from jax import lax
from jax.experimental import pallas as pl
from jax.experimental.pallas import tpu as pltpu


def _postflat_att_lstm_kernel(
    x_ref,      # (T*BP, I)  time-major, batch padded to BP (row r = t*BP + b)
    wih_ref,    # (I, 4H)    input->gate weights (torch weight_ih_l0 transposed)
    whh_ref,    # (H, 4H)    hidden->gate weights (torch weight_hh_l0 transposed)
    b_ref,      # (1, 4H)    b_ih + b_hh
    attw_ref,   # (1,)       SimpAttLayer scalar weight, in SMEM
    attb_ref,   # (1, S)     SimpAttLayer bias, reshaped from (S, 1)
    dw_ref,     # (S, O)     dense weight (W_dense.T)
    db_ref,     # (1, O)     dense bias
    out_ref,    # (B, O)     output logits (unpadded batch)
    attn_ref,   # (B, S)     attention weights, lane-dense (softmax over S)
    flat_ref,   # (BP, S)    VMEM scratch: flattened hidden states, lane offset t*H
):
    B, O = out_ref.shape
    BP, S = flat_ref.shape
    H = whh_ref.shape[0]
    T = S // H

    # --- hoisted input projection: one MXU matmul for all timesteps (+ bias),
    #     entirely off the recurrent critical path ---
    xg = jnp.dot(x_ref[...], wih_ref[...],
                 preferred_element_type=jnp.float32) + b_ref[...]   # (T*BP, 4H)

    whh = whh_ref[...]                                              # (H, 4H)

    # --- LSTM recurrence (gate order i, f, g, o; zero initial states) ---
    # T is a small static constant: fully unrolled, h/c stay in vregs.
    # BP is a sublane multiple, so the per-step xg row slice is whole (8, 4H)
    # tiles (no sub-sublane relayout inside the serial loop).
    h = jnp.zeros((BP, H), jnp.float32)
    c = jnp.zeros((BP, H), jnp.float32)
    for t in range(T):
        gates = xg[t * BP:(t + 1) * BP, :] + jnp.dot(
            h, whh, preferred_element_type=jnp.float32)             # (BP, 4H)
        # Merged activations: the whole gates tensor is one vreg, so a single
        # sigmoid push + a single tanh push cover i/f/o and g (3 EUP pushes
        # per step including tanh(c), down from 5).
        sig = jax.nn.sigmoid(gates)                                 # (BP, 4H)
        th = jnp.tanh(gates)                                        # (BP, 4H)
        i_g = sig[:, 0 * H:1 * H]
        f_g = sig[:, 1 * H:2 * H]
        g_g = th[:, 2 * H:3 * H]
        o_g = sig[:, 3 * H:4 * H]
        c = f_g * c + i_g * g_g
        h = o_g * jnp.tanh(c)
        # Lane-offset store into the flat scratch (torch Flatten order
        # s = t*H + h); lands in the idle store slot, overlaps the next step.
        flat_ref[:, t * H:(t + 1) * H] = h

    # --- post-flatten simple attention: e = tanh(flat * w + b), softmax over S ---
    flat = flat_ref[...]                                            # (BP, S)
    attw = attw_ref[0]                                              # SMEM scalar
    e = jnp.tanh(flat * attw + attb_ref[...])                       # (BP, S)
    e_max = jnp.max(e, axis=1, keepdims=True)                       # (BP, 1)
    p = jnp.exp(e - e_max)
    denom = jnp.sum(p, axis=1, keepdims=True)                       # (BP, 1)
    a = p / denom                                                   # exact normalization
    weighted = flat * a                                             # (BP, S)

    # --- dense head: single (BP,S) x (S,O) MXU matmul ---
    out = jnp.dot(weighted, dw_ref[...],
                  preferred_element_type=jnp.float32) + db_ref[...]  # (BP, O)

    # Drop the padded batch rows at the final stores.
    out_ref[...] = out[:B, :]
    attn_ref[...] = a[:B, :]


def post_flat_att_recurrent(x, params):
    """x: (B, T, I) batch-first, float32. Returns (out (B, O), attn (B, T*H, 1))."""
    B, T, I = x.shape
    H = params["w_hh"].shape[1]
    O = params["dense_b"].shape[0]
    S = T * H
    BP = ((B + 7) // 8) * 8   # pad batch to a sublane multiple

    # Glue: layout prep only (no compute).  Time-major + batch-padded flatten
    # of x makes the hoisted x@Wih a single matmul and each step's rows one
    # aligned (BP, 4H) tile.  (Ideally the producer supplies x already
    # time-major/padded; XLA fuses this transpose+pad+reshape into one copy.)
    x_t = jnp.transpose(x, (1, 0, 2)).astype(jnp.float32)         # (T, B, I)
    if BP != B:
        x_t = jnp.pad(x_t, ((0, 0), (0, BP - B), (0, 0)))         # (T, BP, I)
    x_tb = x_t.reshape(T * BP, I)

    wih_t = params["w_ih"].T                                      # (I, 4H)
    whh_t = params["w_hh"].T                                      # (H, 4H)
    bias = (params["b_ih"] + params["b_hh"]).reshape(1, 4 * H)    # (1, 4H)
    attw = params["att_w"].reshape(1).astype(jnp.float32)         # (1,) -> SMEM
    attb = params["att_b"].reshape(1, S)                          # (S,1) -> (1,S)
    dw = params["dense_w"].T                                      # (O,S) -> (S,O)
    db = params["dense_b"].reshape(1, O)

    vmem = pl.BlockSpec(memory_space=pltpu.MemorySpace.VMEM)
    smem = pl.BlockSpec(memory_space=pltpu.MemorySpace.SMEM)
    out, attn_flat = pl.pallas_call(
        _postflat_att_lstm_kernel,
        out_shape=(
            jax.ShapeDtypeStruct((B, O), jnp.float32),
            jax.ShapeDtypeStruct((B, S), jnp.float32),   # lane-dense attention
        ),
        in_specs=[vmem, vmem, vmem, vmem, smem, vmem, vmem, vmem],
        out_specs=(vmem, vmem),
        scratch_shapes=[pltpu.VMEM((BP, S), jnp.float32)],
    )(x_tb, wih_t, whh_t, bias, attw, attb, dw, db)

    # Free reshape (no transpose): (B, S) -> torch-ordered (B, S, 1).
    return out, attn_flat.reshape(B, S, 1)


def init_params(key, *, input_size, n_hiddens, seq_len, output_size):
    """Deterministic synthetic params with the same shapes as the torch module."""
    H, I, T, O = n_hiddens, input_size, seq_len, output_size
    S = T * H
    ks = jax.random.split(key, 8)
    k_rnn = 1.0 / float(jnp.sqrt(H))
    k_dense = 1.0 / float(jnp.sqrt(S))

    def u(kk, shape, bound):
        return jax.random.uniform(kk, shape, jnp.float32, -bound, bound)

    return {
        "w_ih": u(ks[0], (4 * H, I), k_rnn),     # torch weight_ih_l0
        "w_hh": u(ks[1], (4 * H, H), k_rnn),     # torch weight_hh_l0
        "b_ih": u(ks[2], (4 * H,), k_rnn),
        "b_hh": u(ks[3], (4 * H,), k_rnn),
        "att_w": u(ks[4], (1, 1), 1.0),          # SimpAttLayer W
        "att_b": u(ks[5], (S, 1), 0.1),          # SimpAttLayer b
        "dense_w": u(ks[6], (O, S), k_dense),    # nn.Linear(S, O).weight
        "dense_b": u(ks[7], (O,), k_dense),
    }


def reference_forward(x, params):
    """Pure-JAX reference mirroring the PyTorch forward."""
    B, T, I = x.shape
    H = params["w_hh"].shape[1]
    S = T * H
    wih_t = params["w_ih"].T
    whh_t = params["w_hh"].T
    bias = params["b_ih"] + params["b_hh"]

    def step(carry, x_t):
        h, c = carry
        gates = x_t @ wih_t + h @ whh_t + bias
        i_g = jax.nn.sigmoid(gates[:, :H])
        f_g = jax.nn.sigmoid(gates[:, H:2 * H])
        g_g = jnp.tanh(gates[:, 2 * H:3 * H])
        o_g = jax.nn.sigmoid(gates[:, 3 * H:])
        c = f_g * c + i_g * g_g
        h = o_g * jnp.tanh(c)
        return (h, c), h

    h0 = jnp.zeros((B, H), jnp.float32)
    _, hs = lax.scan(step, (h0, h0), jnp.transpose(x, (1, 0, 2)))
    rnn_out = jnp.transpose(hs, (1, 0, 2))                    # (B, T, H)
    flat = rnn_out.reshape(B, S)[..., None]                   # (B, S, 1)
    e = jnp.tanh(flat * params["att_w"][0, 0] + params["att_b"][None])
    a = jax.nn.softmax(e, axis=1)                             # (B, S, 1)
    att_out = (flat * a)[..., 0]                              # (B, S)
    out = att_out @ params["dense_w"].T + params["dense_b"]   # (B, O)
    return out, a


if __name__ == "__main__":
    # Small shapes consistent with the module: batch=2, seq_len=8, input=4, hidden=4, out=2.
    B, T, I, H, O = 2, 8, 4, 4, 2
    key = jax.random.PRNGKey(0)
    kx, kp = jax.random.split(key)
    x = jax.random.normal(kx, (B, T, I), dtype=jnp.float32)
    params = init_params(kp, input_size=I, n_hiddens=H, seq_len=T, output_size=O)

    out, attn = jax.jit(post_flat_att_recurrent)(x, params)
    out = jax.block_until_ready(out)
    attn = jax.block_until_ready(attn)

    ref_out, ref_attn = reference_forward(x, params)
    assert out.shape == (B, O) and attn.shape == (B, T * H, 1)
    assert jnp.allclose(out, ref_out, atol=1e-3, rtol=1e-3)
    assert jnp.allclose(attn, ref_attn, atol=1e-3, rtol=1e-3)
    # Exact softmax normalization: attention weights sum to 1 per row.
    assert jnp.allclose(attn.sum(axis=1), 1.0, atol=1e-5)
    print("KERNEL_OK")
</pallas_src>

<mosaic_0001>
module attributes {stable_mosaic.version = 11 : i64} {
  func.func @_postflat_att_lstm_kernel(%arg0: memref<64x4xf32, #tpu.memory_space<vmem>>, %arg1: memref<4x16xf32, #tpu.memory_space<vmem>>, %arg2: memref<4x16xf32, #tpu.memory_space<vmem>>, %arg3: memref<1x16xf32, #tpu.memory_space<vmem>>, %arg4: memref<1xf32, #tpu.memory_space<smem>>, %arg5: memref<1x32xf32, #tpu.memory_space<vmem>>, %arg6: memref<32x2xf32, #tpu.memory_space<vmem>>, %arg7: memref<1x2xf32, #tpu.memory_space<vmem>>, %arg8: memref<2x2xf32, #tpu.memory_space<vmem>>, %arg9: memref<2x32xf32, #tpu.memory_space<vmem>>, %arg10: memref<8x32xf32, #tpu.memory_space<vmem>>) attributes {dimension_semantics = [], scalar_prefetch = 0 : i64, scratch_operands = 1 : i64, tpu.core_type = #tpu.core_type<tc>} {
    %c0 = arith.constant 0 : index
    %c0_0 = arith.constant 0 : index
    %0 = vector.load %arg0[%c0, %c0_0] : memref<64x4xf32, #tpu.memory_space<vmem>>, vector<64x4xf32>
    %c0_1 = arith.constant 0 : index
    %c0_2 = arith.constant 0 : index
    %1 = vector.load %arg1[%c0_1, %c0_2] : memref<4x16xf32, #tpu.memory_space<vmem>>, vector<4x16xf32>
    %cst = arith.constant dense<0.000000e+00> : vector<64x16xf32>
    %2 = tpu.matmul %0, %1, %cst {dimension_numbers = #tpu.dot_dimension_numbers<[1], [0], [0], [1], [0, 0, 1, 1], [], []>} : vector<64x4xf32>, vector<4x16xf32>, vector<64x16xf32> -> vector<64x16xf32>
    %c0_3 = arith.constant 0 : index
    %c0_4 = arith.constant 0 : index
    %3 = vector.load %arg3[%c0_3, %c0_4] : memref<1x16xf32, #tpu.memory_space<vmem>>, vector<1x16xf32>
    %4 = vector.broadcast %3 : vector<1x16xf32> to vector<64x16xf32>
    %5 = arith.addf %2, %4 : vector<64x16xf32>
    %c0_5 = arith.constant 0 : index
    %c0_6 = arith.constant 0 : index
    %6 = vector.load %arg2[%c0_5, %c0_6] : memref<4x16xf32, #tpu.memory_space<vmem>>, vector<4x16xf32>
    %cst_7 = arith.constant 0.000000e+00 : f32
    %7 = vector.broadcast %cst_7 : f32 to vector<8x4xf32>
    %cst_8 = arith.constant 0.000000e+00 : f32
    %8 = vector.broadcast %cst_8 : f32 to vector<8x4xf32>
    %9 = vector.extract_strided_slice %5 {offsets = [0, 0], sizes = [8, 16], strides = [1, 1]} : vector<64x16xf32> to vector<8x16xf32>
    %cst_9 = arith.constant dense<0.000000e+00> : vector<8x16xf32>
    %10 = tpu.matmul %7, %6, %cst_9 {dimension_numbers = #tpu.dot_dimension_numbers<[1], [0], [0], [1], [0, 0, 1, 1], [], []>} : vector<8x4xf32>, vector<4x16xf32>, vector<8x16xf32> -> vector<8x16xf32>
    %11 = arith.addf %9, %10 : vector<8x16xf32>
    %12 = arith.negf %11 : vector<8x16xf32>
    %13 = math.exp %12 : vector<8x16xf32>
    %cst_10 = arith.constant 1.000000e+00 : f32
    %14 = vector.broadcast %cst_10 : f32 to vector<8x16xf32>
    %15 = arith.addf %14, %13 : vector<8x16xf32>
    %16 = arith.divf %14, %15 : vector<8x16xf32>
    %17 = math.tanh %11 : vector<8x16xf32>
    %18 = vector.extract_strided_slice %16 {offsets = [0, 0], sizes = [8, 4], strides = [1, 1]} : vector<8x16xf32> to vector<8x4xf32>
    %19 = vector.extract_strided_slice %16 {offsets = [0, 4], sizes = [8, 4], strides = [1, 1]} : vector<8x16xf32> to vector<8x4xf32>
    %20 = vector.extract_strided_slice %17 {offsets = [0, 8], sizes = [8, 4], strides = [1, 1]} : vector<8x16xf32> to vector<8x4xf32>
    %21 = vector.extract_strided_slice %16 {offsets = [0, 12], sizes = [8, 4], strides = [1, 1]} : vector<8x16xf32> to vector<8x4xf32>
    %22 = arith.mulf %19, %8 : vector<8x4xf32>
    %23 = arith.mulf %18, %20 : vector<8x4xf32>
    %24 = arith.addf %22, %23 : vector<8x4xf32>
    %25 = math.tanh %24 : vector<8x4xf32>
    %26 = arith.mulf %21, %25 : vector<8x4xf32>
    %c0_11 = arith.constant 0 : index
    %c0_12 = arith.constant 0 : index
    %27 = vector.load %arg10[%c0_11, %c0_12] : memref<8x32xf32, #tpu.memory_space<vmem>>, vector<8x4xf32>
    tpu.vector_store %arg10[%c0_11, %c0_12], %26 {strides = array<i32>} : memref<8x32xf32, #tpu.memory_space<vmem>>, vector<8x4xf32>,
    %28 = vector.extract_strided_slice %5 {offsets = [8, 0], sizes = [8, 16], strides = [1, 1]} : vector<64x16xf32> to vector<8x16xf32>
    %cst_13 = arith.constant dense<0.000000e+00> : vector<8x16xf32>
    %29 = tpu.matmul %26, %6, %cst_13 {dimension_numbers = #tpu.dot_dimension_numbers<[1], [0], [0], [1], [0, 0, 1, 1], [], []>} : vector<8x4xf32>, vector<4x16xf32>, vector<8x16xf32> -> vector<8x16xf32>
    %30 = arith.addf %28, %29 : vector<8x16xf32>
    %31 = arith.negf %30 : vector<8x16xf32>
    %32 = math.exp %31 : vector<8x16xf32>
    %cst_14 = arith.constant 1.000000e+00 : f32
    %33 = vector.broadcast %cst_14 : f32 to vector<8x16xf32>
    %34 = arith.addf %33, %32 : vector<8x16xf32>
    %35 = arith.divf %33, %34 : vector<8x16xf32>
    %36 = math.tanh %30 : vector<8x16xf32>
    %37 = vector.extract_strided_slice %35 {offsets = [0, 0], sizes = [8, 4], strides = [1, 1]} : vector<8x16xf32> to vector<8x4xf32>
    %38 = vector.extract_strided_slice %35 {offsets = [0, 4], sizes = [8, 4], strides = [1, 1]} : vector<8x16xf32> to vector<8x4xf32>
    %39 = vector.extract_strided_slice %36 {offsets = [0, 8], sizes = [8, 4], strides = [1, 1]} : vector<8x16xf32> to vector<8x4xf32>
    %40 = vector.extract_strided_slice %35 {offsets = [0, 12], sizes = [8, 4], strides = [1, 1]} : vector<8x16xf32> to vector<8x4xf32>
    %41 = arith.mulf %38, %24 : vector<8x4xf32>
    %42 = arith.mulf %37, %39 : vector<8x4xf32>
    %43 = arith.addf %41, %42 : vector<8x4xf32>
    %44 = math.tanh %43 : vector<8x4xf32>
    %45 = arith.mulf %40, %44 : vector<8x4xf32>
    %c0_15 = arith.constant 0 : index
    %c4 = arith.constant 4 : index
    %46 = vector.load %arg10[%c0_15, %c4] : memref<8x32xf32, #tpu.memory_space<vmem>>, vector<8x4xf32>
    tpu.vector_store %arg10[%c0_15, %c4], %45 {strides = array<i32>} : memref<8x32xf32, #tpu.memory_space<vmem>>, vector<8x4xf32>,
    %47 = vector.extract_strided_slice %5 {offsets = [16, 0], sizes = [8, 16], strides = [1, 1]} : vector<64x16xf32> to vector<8x16xf32>
    %cst_16 = arith.constant dense<0.000000e+00> : vector<8x16xf32>
    %48 = tpu.matmul %45, %6, %cst_16 {dimension_numbers = #tpu.dot_dimension_numbers<[1], [0], [0], [1], [0, 0, 1, 1], [], []>} : vector<8x4xf32>, vector<4x16xf32>, vector<8x16xf32> -> vector<8x16xf32>
    %49 = arith.addf %47, %48 : vector<8x16xf32>
    %50 = arith.negf %49 : vector<8x16xf32>
    %51 = math.exp %50 : vector<8x16xf32>
    %cst_17 = arith.constant 1.000000e+00 : f32
    %52 = vector.broadcast %cst_17 : f32 to vector<8x16xf32>
    %53 = arith.addf %52, %51 : vector<8x16xf32>
    %54 = arith.divf %52, %53 : vector<8x16xf32>
    %55 = math.tanh %49 : vector<8x16xf32>
    %56 = vector.extract_strided_slice %54 {offsets = [0, 0], sizes = [8, 4], strides = [1, 1]} : vector<8x16xf32> to vector<8x4xf32>
    %57 = vector.extract_strided_slice %54 {offsets = [0, 4], sizes = [8, 4], strides = [1, 1]} : vector<8x16xf32> to vector<8x4xf32>
    %58 = vector.extract_strided_slice %55 {offsets = [0, 8], sizes = [8, 4], strides = [1, 1]} : vector<8x16xf32> to vector<8x4xf32>
    %59 = vector.extract_strided_slice %54 {offsets = [0, 12], sizes = [8, 4], strides = [1, 1]} : vector<8x16xf32> to vector<8x4xf32>
    %60 = arith.mulf %57, %43 : vector<8x4xf32>
    %61 = arith.mulf %56, %58 : vector<8x4xf32>
    %62 = arith.addf %60, %61 : vector<8x4xf32>
    %63 = math.tanh %62 : vector<8x4xf32>
    %64 = arith.mulf %59, %63 : vector<8x4xf32>
    %c0_18 = arith.constant 0 : index
    %c8 = arith.constant 8 : index
    %65 = vector.load %arg10[%c0_18, %c8] : memref<8x32xf32, #tpu.memory_space<vmem>>, vector<8x4xf32>
    tpu.vector_store %arg10[%c0_18, %c8], %64 {strides = array<i32>} : memref<8x32xf32, #tpu.memory_space<vmem>>, vector<8x4xf32>,
    %66 = vector.extract_strided_slice %5 {offsets = [24, 0], sizes = [8, 16], strides = [1, 1]} : vector<64x16xf32> to vector<8x16xf32>
    %cst_19 = arith.constant dense<0.000000e+00> : vector<8x16xf32>
    %67 = tpu.matmul %64, %6, %cst_19 {dimension_numbers = #tpu.dot_dimension_numbers<[1], [0], [0], [1], [0, 0, 1, 1], [], []>} : vector<8x4xf32>, vector<4x16xf32>, vector<8x16xf32> -> vector<8x16xf32>
    %68 = arith.addf %66, %67 : vector<8x16xf32>
    %69 = arith.negf %68 : vector<8x16xf32>
    %70 = math.exp %69 : vector<8x16xf32>
    %cst_20 = arith.constant 1.000000e+00 : f32
    %71 = vector.broadcast %cst_20 : f32 to vector<8x16xf32>
    %72 = arith.addf %71, %70 : vector<8x16xf32>
    %73 = arith.divf %71, %72 : vector<8x16xf32>
    %74 = math.tanh %68 : vector<8x16xf32>
    %75 = vector.extract_strided_slice %73 {offsets = [0, 0], sizes = [8, 4], strides = [1, 1]} : vector<8x16xf32> to vector<8x4xf32>
    %76 = vector.extract_strided_slice %73 {offsets = [0, 4], sizes = [8, 4], strides = [1, 1]} : vector<8x16xf32> to vector<8x4xf32>
    %77 = vector.extract_strided_slice %74 {offsets = [0, 8], sizes = [8, 4], strides = [1, 1]} : vector<8x16xf32> to vector<8x4xf32>
    %78 = vector.extract_strided_slice %73 {offsets = [0, 12], sizes = [8, 4], strides = [1, 1]} : vector<8x16xf32> to vector<8x4xf32>
    %79 = arith.mulf %76, %62 : vector<8x4xf32>
    %80 = arith.mulf %75, %77 : vector<8x4xf32>
    %81 = arith.addf %79, %80 : vector<8x4xf32>
    %82 = math.tanh %81 : vector<8x4xf32>
    %83 = arith.mulf %78, %82 : vector<8x4xf32>
    %c0_21 = arith.constant 0 : index
    %c12 = arith.constant 12 : index
    %84 = vector.load %arg10[%c0_21, %c12] : memref<8x32xf32, #tpu.memory_space<vmem>>, vector<8x4xf32>
    tpu.vector_store %arg10[%c0_21, %c12], %83 {strides = array<i32>} : memref<8x32xf32, #tpu.memory_space<vmem>>, vector<8x4xf32>,
    %85 = vector.extract_strided_slice %5 {offsets = [32, 0], sizes = [8, 16], strides = [1, 1]} : vector<64x16xf32> to vector<8x16xf32>
    %cst_22 = arith.constant dense<0.000000e+00> : vector<8x16xf32>
    %86 = tpu.matmul %83, %6, %cst_22 {dimension_numbers = #tpu.dot_dimension_numbers<[1], [0], [0], [1], [0, 0, 1, 1], [], []>} : vector<8x4xf32>, vector<4x16xf32>, vector<8x16xf32> -> vector<8x16xf32>
    %87 = arith.addf %85, %86 : vector<8x16xf32>
    %88 = arith.negf %87 : vector<8x16xf32>
    %89 = math.exp %88 : vector<8x16xf32>
    %cst_23 = arith.constant 1.000000e+00 : f32
    %90 = vector.broadcast %cst_23 : f32 to vector<8x16xf32>
    %91 = arith.addf %90, %89 : vector<8x16xf32>
    %92 = arith.divf %90, %91 : vector<8x16xf32>
    %93 = math.tanh %87 : vector<8x16xf32>
    %94 = vector.extract_strided_slice %92 {offsets = [0, 0], sizes = [8, 4], strides = [1, 1]} : vector<8x16xf32> to vector<8x4xf32>
    %95 = vector.extract_strided_slice %92 {offsets = [0, 4], sizes = [8, 4], strides = [1, 1]} : vector<8x16xf32> to vector<8x4xf32>
    %96 = vector.extract_strided_slice %93 {offsets = [0, 8], sizes = [8, 4], strides = [1, 1]} : vector<8x16xf32> to vector<8x4xf32>
    %97 = vector.extract_strided_slice %92 {offsets = [0, 12], sizes = [8, 4], strides = [1, 1]} : vector<8x16xf32> to vector<8x4xf32>
    %98 = arith.mulf %95, %81 : vector<8x4xf32>
    %99 = arith.mulf %94, %96 : vector<8x4xf32>
    %100 = arith.addf %98, %99 : vector<8x4xf32>
    %101 = math.tanh %100 : vector<8x4xf32>
    %102 = arith.mulf %97, %101 : vector<8x4xf32>
    %c0_24 = arith.constant 0 : index
    %c16 = arith.constant 16 : index
    %103 = vector.load %arg10[%c0_24, %c16] : memref<8x32xf32, #tpu.memory_space<vmem>>, vector<8x4xf32>
    tpu.vector_store %arg10[%c0_24, %c16], %102 {strides = array<i32>} : memref<8x32xf32, #tpu.memory_space<vmem>>, vector<8x4xf32>,
    %104 = vector.extract_strided_slice %5 {offsets = [40, 0], sizes = [8, 16], strides = [1, 1]} : vector<64x16xf32> to vector<8x16xf32>
    %cst_25 = arith.constant dense<0.000000e+00> : vector<8x16xf32>
    %105 = tpu.matmul %102, %6, %cst_25 {dimension_numbers = #tpu.dot_dimension_numbers<[1], [0], [0], [1], [0, 0, 1, 1], [], []>} : vector<8x4xf32>, vector<4x16xf32>, vector<8x16xf32> -> vector<8x16xf32>
    %106 = arith.addf %104, %105 : vector<8x16xf32>
    %107 = arith.negf %106 : vector<8x16xf32>
    %108 = math.exp %107 : vector<8x16xf32>
    %cst_26 = arith.constant 1.000000e+00 : f32
    %109 = vector.broadcast %cst_26 : f32 to vector<8x16xf32>
    %110 = arith.addf %109, %108 : vector<8x16xf32>
    %111 = arith.divf %109, %110 : vector<8x16xf32>
    %112 = math.tanh %106 : vector<8x16xf32>
    %113 = vector.extract_strided_slice %111 {offsets = [0, 0], sizes = [8, 4], strides = [1, 1]} : vector<8x16xf32> to vector<8x4xf32>
    %114 = vector.extract_strided_slice %111 {offsets = [0, 4], sizes = [8, 4], strides = [1, 1]} : vector<8x16xf32> to vector<8x4xf32>
    %115 = vector.extract_strided_slice %112 {offsets = [0, 8], sizes = [8, 4], strides = [1, 1]} : vector<8x16xf32> to vector<8x4xf32>
    %116 = vector.extract_strided_slice %111 {offsets = [0, 12], sizes = [8, 4], strides = [1, 1]} : vector<8x16xf32> to vector<8x4xf32>
    %117 = arith.mulf %114, %100 : vector<8x4xf32>
    %118 = arith.mulf %113, %115 : vector<8x4xf32>
    %119 = arith.addf %117, %118 : vector<8x4xf32>
    %120 = math.tanh %119 : vector<8x4xf32>
    %121 = arith.mulf %116, %120 : vector<8x4xf32>
    %c0_27 = arith.constant 0 : index
    %c20 = arith.constant 20 : index
    %122 = vector.load %arg10[%c0_27, %c20] : memref<8x32xf32, #tpu.memory_space<vmem>>, vector<8x4xf32>
    tpu.vector_store %arg10[%c0_27, %c20], %121 {strides = array<i32>} : memref<8x32xf32, #tpu.memory_space<vmem>>, vector<8x4xf32>,
    %123 = vector.extract_strided_slice %5 {offsets = [48, 0], sizes = [8, 16], strides = [1, 1]} : vector<64x16xf32> to vector<8x16xf32>
    %cst_28 = arith.constant dense<0.000000e+00> : vector<8x16xf32>
    %124 = tpu.matmul %121, %6, %cst_28 {dimension_numbers = #tpu.dot_dimension_numbers<[1], [0], [0], [1], [0, 0, 1, 1], [], []>} : vector<8x4xf32>, vector<4x16xf32>, vector<8x16xf32> -> vector<8x16xf32>
    %125 = arith.addf %123, %124 : vector<8x16xf32>
    %126 = arith.negf %125 : vector<8x16xf32>
    %127 = math.exp %126 : vector<8x16xf32>
    %cst_29 = arith.constant 1.000000e+00 : f32
    %128 = vector.broadcast %cst_29 : f32 to vector<8x16xf32>
    %129 = arith.addf %128, %127 : vector<8x16xf32>
    %130 = arith.divf %128, %129 : vector<8x16xf32>
    %131 = math.tanh %125 : vector<8x16xf32>
    %132 = vector.extract_strided_slice %130 {offsets = [0, 0], sizes = [8, 4], strides = [1, 1]} : vector<8x16xf32> to vector<8x4xf32>
    %133 = vector.extract_strided_slice %130 {offsets = [0, 4], sizes = [8, 4], strides = [1, 1]} : vector<8x16xf32> to vector<8x4xf32>
    %134 = vector.extract_strided_slice %131 {offsets = [0, 8], sizes = [8, 4], strides = [1, 1]} : vector<8x16xf32> to vector<8x4xf32>
    %135 = vector.extract_strided_slice %130 {offsets = [0, 12], sizes = [8, 4], strides = [1, 1]} : vector<8x16xf32> to vector<8x4xf32>
    %136 = arith.mulf %133, %119 : vector<8x4xf32>
    %137 = arith.mulf %132, %134 : vector<8x4xf32>
    %138 = arith.addf %136, %137 : vector<8x4xf32>
    %139 = math.tanh %138 : vector<8x4xf32>
    %140 = arith.mulf %135, %139 : vector<8x4xf32>
    %c0_30 = arith.constant 0 : index
    %c24 = arith.constant 24 : index
    %141 = vector.load %arg10[%c0_30, %c24] : memref<8x32xf32, #tpu.memory_space<vmem>>, vector<8x4xf32>
    tpu.vector_store %arg10[%c0_30, %c24], %140 {strides = array<i32>} : memref<8x32xf32, #tpu.memory_space<vmem>>, vector<8x4xf32>,
    %142 = vector.extract_strided_slice %5 {offsets = [56, 0], sizes = [8, 16], strides = [1, 1]} : vector<64x16xf32> to vector<8x16xf32>
    %cst_31 = arith.constant dense<0.000000e+00> : vector<8x16xf32>
    %143 = tpu.matmul %140, %6, %cst_31 {dimension_numbers = #tpu.dot_dimension_numbers<[1], [0], [0], [1], [0, 0, 1, 1], [], []>} : vector<8x4xf32>, vector<4x16xf32>, vector<8x16xf32> -> vector<8x16xf32>
    %144 = arith.addf %142, %143 : vector<8x16xf32>
    %145 = arith.negf %144 : vector<8x16xf32>
    %146 = math.exp %145 : vector<8x16xf32>
    %cst_32 = arith.constant 1.000000e+00 : f32
    %147 = vector.broadcast %cst_32 : f32 to vector<8x16xf32>
    %148 = arith.addf %147, %146 : vector<8x16xf32>
    %149 = arith.divf %147, %148 : vector<8x16xf32>
    %150 = math.tanh %144 : vector<8x16xf32>
    %151 = vector.extract_strided_slice %149 {offsets = [0, 0], sizes = [8, 4], strides = [1, 1]} : vector<8x16xf32> to vector<8x4xf32>
    %152 = vector.extract_strided_slice %149 {offsets = [0, 4], sizes = [8, 4], strides = [1, 1]} : vector<8x16xf32> to vector<8x4xf32>
    %153 = vector.extract_strided_slice %150 {offsets = [0, 8], sizes = [8, 4], strides = [1, 1]} : vector<8x16xf32> to vector<8x4xf32>
    %154 = vector.extract_strided_slice %149 {offsets = [0, 12], sizes = [8, 4], strides = [1, 1]} : vector<8x16xf32> to vector<8x4xf32>
    %155 = arith.mulf %152, %138 : vector<8x4xf32>
    %156 = arith.mulf %151, %153 : vector<8x4xf32>
    %157 = arith.addf %155, %156 : vector<8x4xf32>
    %158 = math.tanh %157 : vector<8x4xf32>
    %159 = arith.mulf %154, %158 : vector<8x4xf32>
    %c0_33 = arith.constant 0 : index
    %c28 = arith.constant 28 : index
    %160 = vector.load %arg10[%c0_33, %c28] : memref<8x32xf32, #tpu.memory_space<vmem>>, vector<8x4xf32>
    tpu.vector_store %arg10[%c0_33, %c28], %159 {strides = array<i32>} : memref<8x32xf32, #tpu.memory_space<vmem>>, vector<8x4xf32>,
    %c0_34 = arith.constant 0 : index
    %c0_35 = arith.constant 0 : index
    %161 = vector.load %arg10[%c0_34, %c0_35] : memref<8x32xf32, #tpu.memory_space<vmem>>, vector<8x32xf32>
    %c0_36 = arith.constant 0 : index
    %162 = memref.load %arg4[%c0_36] : memref<1xf32, #tpu.memory_space<smem>>
    %163 = vector.broadcast %162 : f32 to vector<8x32xf32>
    %164 = arith.mulf %161, %163 : vector<8x32xf32>
    %c0_37 = arith.constant 0 : index
    %c0_38 = arith.constant 0 : index
    %165 = vector.load %arg5[%c0_37, %c0_38] : memref<1x32xf32, #tpu.memory_space<vmem>>, vector<1x32xf32>
    %166 = vector.broadcast %165 : vector<1x32xf32> to vector<8x32xf32>
    %167 = arith.addf %164, %166 : vector<8x32xf32>
    %168 = math.tanh %167 : vector<8x32xf32>
    %cst_39 = arith.constant dense<0xFF800000> : vector<8xf32>
    %169 = vector.multi_reduction <maximumf>, %168, %cst_39 [1] : vector<8x32xf32> to vector<8xf32>
    %170 = vector.shape_cast %169 : vector<8xf32> to vector<8x1xf32>
    %171 = vector.broadcast %170 : vector<8x1xf32> to vector<8x32xf32>
    %172 = arith.subf %168, %171 : vector<8x32xf32>
    %173 = math.exp %172 : vector<8x32xf32>
    %cst_40 = arith.constant dense<0.000000e+00> : vector<8xf32>
    %174 = vector.multi_reduction <add>, %173, %cst_40 [1] : vector<8x32xf32> to vector<8xf32>
    %175 = vector.shape_cast %174 : vector<8xf32> to vector<8x1xf32>
    %176 = vector.broadcast %175 : vector<8x1xf32> to vector<8x32xf32>
    %177 = arith.divf %173, %176 : vector<8x32xf32>
    %178 = arith.mulf %161, %177 : vector<8x32xf32>
    %c0_41 = arith.constant 0 : index
    %c0_42 = arith.constant 0 : index
    %179 = vector.load %arg6[%c0_41, %c0_42] : memref<32x2xf32, #tpu.memory_space<vmem>>, vector<32x2xf32>
    %cst_43 = arith.constant dense<0.000000e+00> : vector<8x2xf32>
    %180 = tpu.matmul %178, %179, %cst_43 {dimension_numbers = #tpu.dot_dimension_numbers<[1], [0], [0], [1], [0, 0, 1, 1], [], []>} : vector<8x32xf32>, vector<32x2xf32>, vector<8x2xf32> -> vector<8x2xf32>
    %c0_44 = arith.constant 0 : index
    %c0_45 = arith.constant 0 : index
    %181 = vector.load %arg7[%c0_44, %c0_45] : memref<1x2xf32, #tpu.memory_space<vmem>>, vector<1x2xf32>
    %182 = vector.broadcast %181 : vector<1x2xf32> to vector<8x2xf32>
    %183 = arith.addf %180, %182 : vector<8x2xf32>
    %184 = vector.extract_strided_slice %183 {offsets = [0, 0], sizes = [2, 2], strides = [1, 1]} : vector<8x2xf32> to vector<2x2xf32>
    %c0_46 = arith.constant 0 : index
    %c0_47 = arith.constant 0 : index
    %185 = vector.load %arg8[%c0_46, %c0_47] : memref<2x2xf32, #tpu.memory_space<vmem>>, vector<2x2xf32>
    tpu.vector_store %arg8[%c0_46, %c0_47], %184 {strides = array<i32>} : memref<2x2xf32, #tpu.memory_space<vmem>>, vector<2x2xf32>,
    %186 = vector.extract_strided_slice %177 {offsets = [0, 0], sizes = [2, 32], strides = [1, 1]} : vector<8x32xf32> to vector<2x32xf32>
    %c0_48 = arith.constant 0 : index
    %c0_49 = arith.constant 0 : index
    %187 = vector.load %arg9[%c0_48, %c0_49] : memref<2x32xf32, #tpu.memory_space<vmem>>, vector<2x32xf32>
    tpu.vector_store %arg9[%c0_48, %c0_49], %186 {strides = array<i32>} : memref<2x32xf32, #tpu.memory_space<vmem>>, vector<2x32xf32>,
    return
  }
}

</mosaic_0001>

<bundles_post_ra>
// kernel: post_flat_att_recurrent.1
= control target key start
LH: loop header
LB: loop body
LE: loop exit
PB: predicated region body
PF: predicated region fallthrough
CT: control target
= control target key end

     0   :  { %16 = vsyncpa [#allocation5], 0  ;;  %vm75_vm0 = vcmask 1043456   ;;  %vm50_vm1 = vcmask 31744   ;;  %s1680_s0 = inlined_call_operand.vmem [shape: f32[64,4], index: 0, kind: input, shape index: {}]   ;;  %s1681_s1 = inlined_call_operand.vmem [shape: f32[4,16], index: 1, kind: input, shape index: {}]   ;;  %s1682_s2 = inlined_call_operand.vmem [shape: f32[4,16], index: 2, kind: input, shape index: {}]   ;;  %s1683_s3 = inlined_call_operand.vmem [shape: f32[1,16], index: 3, kind: input, shape index: {}]   ;;  %s1684_s4 = inlined_call_operand.<no memory space> [shape: f32[1], index: 4, kind: input, shape index: {}]   ;;  %s1685_s5 = inlined_call_operand.vmem [shape: f32[1,32], index: 5, kind: input, shape index: {}]   ;;  %s1686_s6 = inlined_call_operand.vmem [shape: f32[32,2], index: 6, kind: input, shape index: {}]   ;;  %s1687_s7 = inlined_call_operand.vmem [shape: f32[1,2], index: 7, kind: input, shape index: {}]   ;;  %s1688_s8 = inlined_call_operand.hbm [shape: f32[2,2], index: 8, kind: output, shape index: {0}]   ;;  %s1689_s9 = inlined_call_operand.hbm [shape: f32[2,32], index: 9, kind: output, shape index: {1}]  }
   0x1   :  { %v42_v0 = vld [vmem:[%s1681_s1] sm:$0xf]  ;;  %v40_v2 = vld [vmem:[%s1680_s0 + $0x30] sm:$0xff]  ;;  %v35_v3 = vld [vmem:[%s1680_s0 + $0x8] sm:$0xff] }
   0x2   :  { %v34_v1 = vld [vmem:[%s1680_s0] sm:$0xff]  ;;  %1229 = vmatprep.subr.msk.mxu0 %vm75_vm0, %v42_v0  ;;  %1294 = vmatprep.subr.msk.mxu1 %vm75_vm0, %v42_v0  ;;  %v41_v4 = vld [vmem:[%s1680_s0 + $0x38] sm:$0xff] }
   0x3   :  { %1230 = vmatpush3.msk.msra.mxu0 %vm75_vm0, %v42_v0  ;;  %1295 = vmatpush3.msk.msra.mxu1 %vm75_vm0, %v42_v0 }
   0x4   :  { %17 = vsyncpa [#allocation7], 0  ;;  %1231 = vmatprep.mubr.msk.f32.mxu0 %vm50_vm1, %v34_v1  ;;  %1240 = vmatprep.mubr.msk.f32.mxu1 %vm50_vm1, %v40_v2  ;;  %v1506_v5 = vld [vmem:[%s1682_s2] sm:$0xf]  ;;  %v1421_v6 = vmov 0.0   ;;  %vm1422_vm2 = vmmov 0  }
   0x5   :  { %1232 = vmatmul.mubr.msk.f32.vlgmr.msra.gmra.mxu0 %vm50_vm1, %v35_v3  ;;  %1241 = vmatmul.mubr.msk.f32.vlgmr.msra.gmra.mxu1 %vm50_vm1, %v41_v4  ;;  %v1531_v9 = vld [vmem:[%s1683_s3] ss:$0 sm:$0xff]  ;;  %s1423_s21 = smov 120   ;;  %s1424_s3 = smov 4   ;;  %v36_v44 = vld [vmem:[%s1680_s0 + $0x10] sm:$0xff]  ;;  %v37_v45 = vld [vmem:[%s1680_s0 + $0x18] sm:$0xff] }
   0x6   :  { %1243 = vmatprep.subr.mxu1 %v1421_v6  ;;  %1245 = vmatprep.mubr.msk.f32.mxu1 %vm1422_vm2, %v1421_v6  ;;  %s1425_s22 = smov 8   ;;  %s1426_s23 = smov 116   ;;  %vm392_vm3 = vcmask 64544   ;;  %vm497_vm4 = vcmask 97344   ;;  %vm598_vm5 = vcmask 130144   ;;  %vm704_vm6 = vcmask 162944  }
   0x7   :  { %1244 = vmatpush3.msk.msra.mxu1 %vm75_vm0, %v1506_v5  ;;  %1263 = vmatprep.subr.mxu0 %v1421_v6  ;;  %s1428_s11 = smov 124   ;;  %s1429_s12 = smov 16   ;;  %vm809_vm7 = vcmask 195744   ;;  %vm914_vm8 = vcmask 228544   ;;  %vm1019_vm9 = vcmask 261344   ;;  %vm1034_vm10 = vcmask 261120  }
   0x8   :  { %1248 = vmatprep.subr.mxu1 %v1421_v6  ;;  %1264 = vmatpush3.msk.msra.mxu0 %vm75_vm0, %v1506_v5  ;;  %vm1133_vm11 = vcmask 254976  }
   0x9   :  { %1246 = vmatmul.mubr.f32.vlgmr.msra.gmra.mxu1 %v1421_v6  ;;  %1273 = vmatprep.subr.mxu0 %v1421_v6 }
   0xa   :  { %1249 = vmatpush3.msk.msra.mxu1 %vm75_vm0, %v1506_v5  ;;  %1250 = vmatprep.mubr.msk.f32.mxu1 %vm1422_vm2, %v1421_v6 }
   0xb   :  { %1253 = vmatprep.subr.mxu1 %v1421_v6  ;;  %1234 = vmatprep.mubr.msk.f32.mxu0 %vm50_vm1, %v36_v44 }
   0xc   :  { %1235 = vmatmul.mubr.msk.f32.gmra.mxu0 %vm50_vm1, %v37_v45 }
  0xc5   :  { %v1233_v7 = vpop.f32.mrf.mxu0  ;;  %v1526_v8 = vpop.f32.mrf.mxu1 }
  0xc6   :  { %v151_v30 = vadd.f32 %v1233_v7, %v1531_v9 }
  0xc7   :  { %v145_v10 = vpop.f32.mrf.mxu0  ;;  %v1533_v11 = vpop.f32.mrf.mxu1 }
  0xc8   :  { %v146_v12 = vadd.f32 %v1531_v9, %v145_v10 }
  0xc9   :  { %v257_v13 = vpop.f32.mrf.mxu1 }
  0xca   :  { %v261_v14 = vadd.f32 %v257_v13, %v146_v12 }
  0xcb   :  { %v1247_v15 = vpop.f32.mrf.mxu1 }
  0xcc   :  { %1307 = vtanh.f32 %v261_v14  ;;  %v1174_v17 = vmul.f32 -1.442695, %v261_v14  ;;  %v1236_v50 = vpop.f32.mrf.mxu0 }
  0xcd   :  { %v161_v10 = vadd.f32 %v1236_v50, %v1531_v9 }
  0xce   :  { %1309 = vpow2.f32 %v1174_v17  ;;  %v155_v51 = vpop.f32.mrf.mxu0 }
  0xcf   :  { %v156_v52 = vadd.f32 %v1531_v9, %v155_v51 }
  0xd9   :  { %v1308_v16 = vpop.eup %1307 }
  0xda   :  { %271 = vrot.lane.b32.xlu0 %v1308_v16, %s1423_s21 }
  0xdb   :  { %v1310_v18 = vpop.eup %1309 }
  0xdc   :  { %v265_v19 = vadd.f32 1.0, %v1310_v18 }
  0xde   :  { %1311 = vrcp.f32 %v265_v19 }
  0xeb   :  { %v1312_v20 = vpop.eup %1311 }
  0xec   :  { %v269_v23 = vmul.f32 0.0, %v1312_v20 }
 0x14c   :  { %v272_v21 = vpop.permute.xlu0 %271 }
 0x14d   :  { %v274_v22 = vmul.f32 %v1312_v20, %v272_v21 }
 0x14f   :  { %276 = vrot.lane.b32.xlu0 %v274_v22, %s1424_s3 }
 0x1c1   :  { %v277_v24 = vpop.permute.xlu0 %276 }
 0x1c2   :  { %v279_v25 = vadd.f32 %v277_v24, %v269_v23 }
 0x1c4   :  { %1313 = vtanh.f32 %v279_v25 }
 0x1d1   :  { %v1314_v26 = vpop.eup %1313 }
 0x1d2   :  { %282 = vrot.lane.b32.xlu1 %v1314_v26, %s1425_s22  ;;  %v39_v26 = vld [vmem:[%s1680_s0 + $0x28] sm:$0xff] }
 0x244   :  { %v283_v27 = vpop.permute.xlu1 %282 }
 0x245   :  { %v285_v28 = vmul.f32 %v1312_v20, %v283_v27 }
 0x247   :  { %287 = vrot.lane.b32.xlu1 %v285_v28, %s1426_s23 }
 0x2b9   :  { %v288_v29 = vpop.permute.xlu1 %287 }
 0x2ba   :  { %290 = vst.msk [vmem:[#allocation2] sm:$0xff] %vm50_vm1, %v288_v29  ;;  %1251 = vmatmul.mubr.msk.f32.vlgmr.msra.gmra.mxu1 %vm50_vm1, %v288_v29 }
 0x2bb   :  { %1254 = vmatpush3.msk.msra.mxu1 %vm75_vm0, %v1506_v5  ;;  %1255 = vmatprep.mubr.msk.f32.mxu1 %vm1422_vm2, %v1421_v6 }
 0x2bc   :  { %1258 = vmatprep.subr.mxu1 %v1421_v6 }
 0x37a   :  { %v359_v31 = vpop.f32.mrf.mxu1 }
 0x37b   :  { %v363_v32 = vadd.f32 %v359_v31, %v151_v30 }
 0x37c   :  { %v1252_v33 = vpop.f32.mrf.mxu1 }
 0x37d   :  { %1315 = vtanh.f32 %v363_v32  ;;  %v1177_v35 = vmul.f32 -1.442695, %v363_v32 }
 0x37f   :  { %1317 = vpow2.f32 %v1177_v35 }
 0x38a   :  { %v1316_v34 = vpop.eup %1315 }
 0x38b   :  { %373 = vrot.lane.b32.xlu0 %v1316_v34, %s1423_s21 }
 0x38c   :  { %v1318_v36 = vpop.eup %1317 }
 0x38d   :  { %v367_v37 = vadd.f32 1.0, %v1318_v36 }
 0x38f   :  { %1319 = vrcp.f32 %v367_v37 }
 0x39c   :  { %v1320_v38 = vpop.eup %1319 }
 0x39d   :  { %v371_v41 = vmul.f32 %v1320_v38, %v279_v25  ;;  %v38_v25 = vld [vmem:[%s1680_s0 + $0x20] sm:$0xff]  ;;  %s1427_s0 = smov 12  }
 0x39e   :  { %1237 = vmatprep.mubr.msk.f32.mxu0 %vm50_vm1, %v38_v25 }
 0x39f   :  { %1238 = vmatmul.mubr.msk.f32.gmra.mxu0 %vm50_vm1, %v39_v26 }
 0x3a0   :  { %1265 = vmatprep.mubr.msk.f32.mxu0 %vm1422_vm2, %v1421_v6 }
 0x3fd   :  { %v374_v39 = vpop.permute.xlu0 %373 }
 0x3fe   :  { %v376_v40 = vmul.f32 %v1320_v38, %v374_v39 }
 0x400   :  { %378 = vrot.lane.b32.xlu1 %v376_v40, %s1424_s3 }
 0x45f   :  { %v1239_v31 = vpop.f32.mrf.mxu0 }
 0x461   :  { %v165_v32 = vpop.f32.mrf.mxu0 }
 0x462   :  { %v166_v33 = vadd.f32 %v1531_v9, %v165_v32 }
 0x472   :  { %v379_v42 = vpop.permute.xlu1 %378 }
 0x473   :  { %v381_v43 = vadd.f32 %v379_v42, %v371_v41 }
 0x475   :  { %1321 = vtanh.f32 %v381_v43 }
 0x482   :  { %v1322_v46 = vpop.eup %1321 }
 0x483   :  { %384 = vrot.lane.b32.xlu0 %v1322_v46, %s1425_s22 }
 0x4f5   :  { %v385_v47 = vpop.permute.xlu0 %384 }
 0x4f6   :  { %v1559_v48 = vmul.f32 %v1320_v38, %v385_v47 }
 0x4f8   :  { %394 = vrot.lane.b32.xlu1 %v1559_v48, %s1426_s23 }
 0x56a   :  { %v395_v49 = vpop.permute.xlu1 %394 }
 0x56b   :  { %1256 = vmatmul.mubr.msk.f32.vlgmr.msra.gmra.mxu1 %vm50_vm1, %v395_v49 }
 0x56c   :  { %1259 = vmatpush3.msk.msra.mxu1 %vm75_vm0, %v1506_v5  ;;  %1260 = vmatprep.mubr.msk.f32.mxu1 %vm1422_vm2, %v1421_v6 }
 0x56d   :  { %1268 = vmatprep.subr.mxu1 %v1421_v6 }
 0x62b   :  { %v464_v53 = vpop.f32.mrf.mxu1 }
 0x62c   :  { %v468_v54 = vadd.f32 %v464_v53, %v156_v52  ;;  %v171_v52 = vadd.f32 %v1239_v31, %v1531_v9 }
 0x62d   :  { %v1257_v55 = vpop.f32.mrf.mxu1 }
 0x62e   :  { %1323 = vtanh.f32 %v468_v54  ;;  %v1180_v57 = vmul.f32 -1.442695, %v468_v54 }
 0x630   :  { %1325 = vpow2.f32 %v1180_v57 }
 0x63b   :  { %v1324_v56 = vpop.eup %1323 }
 0x63c   :  { %478 = vrot.lane.b32.xlu0 %v1324_v56, %s1423_s21 }
 0x63d   :  { %v1326_v58 = vpop.eup %1325 }
 0x63e   :  { %v472_v59 = vadd.f32 1.0, %v1326_v58 }
 0x640   :  { %1327 = vrcp.f32 %v472_v59 }
 0x64d   :  { %v1328_v60 = vpop.eup %1327 }
 0x64e   :  { %v476_v63 = vmul.f32 %v1328_v60, %v381_v43 }
 0x6ae   :  { %v479_v61 = vpop.permute.xlu0 %478 }
 0x6af   :  { %v481_v62 = vmul.f32 %v1328_v60, %v479_v61 }
 0x6b1   :  { %483 = vrot.lane.b32.xlu1 %v481_v62, %s1424_s3 }
 0x723   :  { %v484_v0 = vpop.permute.xlu1 %483 }
 0x724   :  { %v486_v1 = vadd.f32 %v484_v0, %v476_v63 }
 0x726   :  { %1329 = vtanh.f32 %v486_v1 }
 0x733   :  { %v1330_v2 = vpop.eup %1329 }
 0x734   :  { %489 = vrot.lane.b32.xlu0 %v1330_v2, %s1425_s22 }
 0x7a6   :  { %v490_v3 = vpop.permute.xlu0 %489 }
 0x7a7   :  { %v1573_v4 = vmul.f32 %v1328_v60, %v490_v3 }
 0x7a9   :  { %499 = vrot.lane.b32.xlu1 %v1573_v4, %s1426_s23 }
 0x81b   :  { %v500_v7 = vpop.permute.xlu1 %499 }
 0x81c   :  { %1261 = vmatmul.mubr.msk.f32.vlgmr.msra.gmra.mxu1 %vm50_vm1, %v500_v7 }
 0x81d   :  { %1269 = vmatpush3.msk.msra.mxu1 %vm75_vm0, %v1506_v5  ;;  %1270 = vmatprep.mubr.msk.f32.mxu1 %vm1422_vm2, %v1421_v6 }
 0x81e   :  { %1278 = vmatprep.subr.mxu1 %v1421_v6 }
 0x8dc   :  { %v569_v12 = vpop.f32.mrf.mxu1 }
 0x8dd   :  { %v573_v13 = vadd.f32 %v569_v12, %v161_v10  ;;  %v176_v10 = vadd.f32 %v1531_v9, %v1533_v11 }
 0x8de   :  { %v1262_v14 = vpop.f32.mrf.mxu1 }
 0x8df   :  { %1331 = vtanh.f32 %v573_v13  ;;  %v1183_v16 = vmul.f32 -1.442695, %v573_v13 }
 0x8e1   :  { %1333 = vpow2.f32 %v1183_v16 }
 0x8ec   :  { %v1332_v15 = vpop.eup %1331 }
 0x8ed   :  { %583 = vrot.lane.b32.xlu0 %v1332_v15, %s1423_s21 }
 0x8ee   :  { %v1334_v17 = vpop.eup %1333 }
 0x8ef   :  { %v577_v18 = vadd.f32 1.0, %v1334_v17 }
 0x8f1   :  { %1335 = vrcp.f32 %v577_v18 }
 0x8fe   :  { %v1336_v19 = vpop.eup %1335 }
 0x8ff   :  { %v581_v22 = vmul.f32 %v1336_v19, %v486_v1 }
 0x95f   :  { %v584_v20 = vpop.permute.xlu0 %583 }
 0x960   :  { %v586_v21 = vmul.f32 %v1336_v19, %v584_v20 }
 0x962   :  { %588 = vrot.lane.b32.xlu1 %v586_v21, %s1424_s3 }
 0x9d4   :  { %v589_v23 = vpop.permute.xlu1 %588 }
 0x9d5   :  { %v591_v24 = vadd.f32 %v589_v23, %v581_v22 }
 0x9d7   :  { %1337 = vtanh.f32 %v591_v24 }
 0x9e4   :  { %v1338_v27 = vpop.eup %1337 }
 0x9e5   :  { %594 = vrot.lane.b32.xlu0 %v1338_v27, %s1425_s22 }
 0xa57   :  { %v595_v28 = vpop.permute.xlu0 %594 }
 0xa58   :  { %v1597_v29 = vmul.f32 %v1336_v19, %v595_v28  ;;  %v181_v28 = vadd.f32 %v1526_v8, %v1531_v9 }
 0xa5a   :  { %601 = vrot.lane.b32.xlu1 %v1597_v29, %s1426_s23 }
 0xacc   :  { %v602_v30 = vpop.permute.xlu1 %601 }
 0xacd   :  { %1266 = vmatmul.mubr.msk.f32.vlgmr.msra.gmra.mxu0 %vm50_vm1, %v602_v30 }
 0xace   :  { %1274 = vmatpush3.msk.msra.mxu0 %vm75_vm0, %v1506_v5  ;;  %1275 = vmatprep.mubr.msk.f32.mxu0 %vm1422_vm2, %v1421_v6 }
 0xacf   :  { %1283 = vmatprep.subr.mxu0 %v1421_v6 }
 0xb8d   :  { %v671_v34 = vpop.f32.mrf.mxu0 }
 0xb8e   :  { %v675_v35 = vadd.f32 %v671_v34, %v166_v33 }
 0xb8f   :  { %v1267_v36 = vpop.f32.mrf.mxu0 }
 0xb90   :  { %1339 = vtanh.f32 %v675_v35  ;;  %v1186_v38 = vmul.f32 -1.442695, %v675_v35 }
 0xb92   :  { %1341 = vpow2.f32 %v1186_v38 }
 0xb9d   :  { %v1340_v37 = vpop.eup %1339 }
 0xb9e   :  { %685 = vrot.lane.b32.xlu0 %v1340_v37, %s1423_s21 }
 0xb9f   :  { %v1342_v39 = vpop.eup %1341 }
 0xba0   :  { %v679_v40 = vadd.f32 1.0, %v1342_v39 }
 0xba2   :  { %1343 = vrcp.f32 %v679_v40 }
 0xbaf   :  { %v1344_v41 = vpop.eup %1343 }
 0xbb0   :  { %v683_v44 = vmul.f32 %v1344_v41, %v591_v24 }
 0xc10   :  { %v686_v42 = vpop.permute.xlu0 %685 }
 0xc11   :  { %v688_v43 = vmul.f32 %v1344_v41, %v686_v42 }
 0xc13   :  { %690 = vrot.lane.b32.xlu1 %v688_v43, %s1424_s3 }
 0xc85   :  { %v691_v45 = vpop.permute.xlu1 %690 }
 0xc86   :  { %v693_v46 = vadd.f32 %v691_v45, %v683_v44 }
 0xc88   :  { %1345 = vtanh.f32 %v693_v46 }
 0xc95   :  { %v1346_v47 = vpop.eup %1345 }
 0xc96   :  { %696 = vrot.lane.b32.xlu0 %v1346_v47, %s1425_s22 }
 0xd08   :  { %v697_v49 = vpop.permute.xlu0 %696 }
 0xd09   :  { %v1611_v50 = vmul.f32 %v1344_v41, %v697_v49  ;;  %v1023_v49 = vstv %s1684_s4 }
 0xd0b   :  { %706 = vrot.lane.b32.xlu1 %v1611_v50, %s1426_s23 }
 0xd7d   :  { %v707_v51 = vpop.permute.xlu1 %706 }
 0xd7e   :  { %1271 = vmatmul.mubr.msk.f32.vlgmr.msra.gmra.mxu1 %vm50_vm1, %v707_v51  ;;  %v1196_v51 = vld [vmem:[%s1685_s5] ss:$0 sm:$0xff] }
 0xd7f   :  { %1279 = vmatpush3.msk.msra.mxu1 %vm75_vm0, %v1506_v5  ;;  %1280 = vmatprep.mubr.msk.f32.mxu1 %vm1422_vm2, %v1421_v6 }
 0xe3e   :  { %v776_v53 = vpop.f32.mrf.mxu1 }
 0xe3f   :  { %v780_v54 = vadd.f32 %v776_v53, %v171_v52 }
 0xe40   :  { %v1272_v55 = vpop.f32.mrf.mxu1 }
 0xe41   :  { %1347 = vtanh.f32 %v780_v54  ;;  %v1189_v57 = vmul.f32 -1.442695, %v780_v54 }
 0xe43   :  { %1349 = vpow2.f32 %v1189_v57 }
 0xe4e   :  { %v1348_v56 = vpop.eup %1347 }
 0xe4f   :  { %790 = vrot.lane.b32.xlu0 %v1348_v56, %s1423_s21 }
 0xe50   :  { %v1350_v58 = vpop.eup %1349 }
 0xe51   :  { %v784_v59 = vadd.f32 1.0, %v1350_v58 }
 0xe53   :  { %1351 = vrcp.f32 %v784_v59 }
 0xe60   :  { %v1352_v60 = vpop.eup %1351 }
 0xe61   :  { %v788_v62 = vmul.f32 %v1352_v60, %v693_v46 }
 0xec1   :  { %v791_v61 = vpop.permute.xlu0 %790 }
 0xec2   :  { %v793_v5 = vmul.f32 %v1352_v60, %v791_v61  ;;  %v1049_v61 = vld [vmem:[%s1686_s6 + $0x10] sm:$0xff] }
 0xec4   :  { %795 = vrot.lane.b32.xlu1 %v793_v5, %s1424_s3  ;;  %v1048_v5 = vld [vmem:[%s1686_s6 + $0x8] sm:$0xff] }
 0xf36   :  { %v796_v63 = vpop.permute.xlu1 %795 }
 0xf37   :  { %v798_v0 = vadd.f32 %v796_v63, %v788_v62  ;;  %v1047_v62 = vld [vmem:[%s1686_s6] sm:$0xff] }
 0xf39   :  { %1353 = vtanh.f32 %v798_v0 }
 0xf46   :  { %v1354_v1 = vpop.eup %1353 }
 0xf47   :  { %801 = vrot.lane.b32.xlu0 %v1354_v1, %s1425_s22 }
 0xfb9   :  { %v802_v2 = vpop.permute.xlu0 %801 }
 0xfba   :  { %v804_v3 = vmul.f32 %v1352_v60, %v802_v2  ;;  %v1050_v60 = vld [vmem:[%s1686_s6 + $0x18] sm:$0xff] }
 0xfbc   :  { %811 = vrot.lane.b32.xlu1 %v804_v3, %s1426_s23 }
0x102e   :  { %v812_v7 = vpop.permute.xlu1 %811 }
0x102f   :  { %1276 = vmatmul.mubr.msk.f32.vlgmr.msra.gmra.mxu0 %vm50_vm1, %v812_v7 }
0x1030   :  { %1291 = vmatprep.mubr.msk.f32.mxu0 %vm1422_vm2, %v1421_v6  ;;  %1284 = vmatpush3.msra.mxu0 %v1050_v60 }
0x1031   :  { %1285 = vmatprep.subr.mxu0 %v1421_v6 }
0x1032   :  { %1286 = vmatpush3.msra.mxu0 %v1049_v61 }
0x1033   :  { %1287 = vmatprep.subr.mxu0 %v1421_v6 }
0x1034   :  { %1288 = vmatpush3.msra.mxu0 %v1048_v5 }
0x1035   :  { %1289 = vmatprep.subr.mxu0 %v1421_v6 }
0x1036   :  { %1290 = vmatpush3.msra.mxu0 %v1047_v62 }
0x10ef   :  { %v881_v12 = vpop.f32.mrf.mxu0 }
0x10f0   :  { %v885_v13 = vadd.f32 %v881_v12, %v176_v10 }
0x10f1   :  { %v1277_v14 = vpop.f32.mrf.mxu0 }
0x10f2   :  { %1355 = vtanh.f32 %v885_v13  ;;  %v1192_v16 = vmul.f32 -1.442695, %v885_v13 }
0x10f4   :  { %1357 = vpow2.f32 %v1192_v16 }
0x10ff   :  { %v1356_v15 = vpop.eup %1355 }
0x1100   :  { %895 = vrot.lane.b32.xlu0 %v1356_v15, %s1423_s21 }
0x1101   :  { %v1358_v17 = vpop.eup %1357 }
0x1102   :  { %v889_v18 = vadd.f32 1.0, %v1358_v17 }
0x1104   :  { %1359 = vrcp.f32 %v889_v18 }
0x1111   :  { %v1360_v19 = vpop.eup %1359 }
0x1112   :  { %v893_v22 = vmul.f32 %v1360_v19, %v798_v0 }
0x1172   :  { %v896_v20 = vpop.permute.xlu0 %895 }
0x1173   :  { %v898_v21 = vmul.f32 %v1360_v19, %v896_v20 }
0x1175   :  { %900 = vrot.lane.b32.xlu1 %v898_v21, %s1424_s3 }
0x11e7   :  { %v901_v23 = vpop.permute.xlu1 %900 }
0x11e8   :  { %v903_v11 = vadd.f32 %v901_v23, %v893_v22 }
0x11ea   :  { %1361 = vtanh.f32 %v903_v11 }
0x11f7   :  { %v1362_v24 = vpop.eup %1361 }
0x11f8   :  { %906 = vrot.lane.b32.xlu0 %v1362_v24, %s1425_s22 }
0x126a   :  { %v907_v25 = vpop.permute.xlu0 %906 }
0x126b   :  { %v909_v26 = vmul.f32 %v1360_v19, %v907_v25 }
0x126d   :  { %916 = vrot.lane.b32.xlu1 %v909_v26, %s1426_s23 }
0x12df   :  { %v917_v27 = vpop.permute.xlu1 %916 }
0x12e0   :  { %1281 = vmatmul.mubr.msk.f32.vlgmr.msra.gmra.mxu1 %vm50_vm1, %v917_v27 }
0x13a0   :  { %v986_v30 = vpop.f32.mrf.mxu1 }
0x13a1   :  { %v990_v31 = vadd.f32 %v986_v30, %v181_v28 }
0x13a2   :  { %v1282_v32 = vpop.f32.mrf.mxu1 }
0x13a3   :  { %1363 = vtanh.f32 %v990_v31  ;;  %v1195_v34 = vmul.f32 -1.442695, %v990_v31 }
0x13a5   :  { %1365 = vpow2.f32 %v1195_v34 }
0x13b0   :  { %v1364_v33 = vpop.eup %1363 }
0x13b1   :  { %1000 = vrot.lane.b32.xlu0 %v1364_v33, %s1423_s21 }
0x13b2   :  { %v1366_v35 = vpop.eup %1365 }
0x13b3   :  { %v994_v36 = vadd.f32 1.0, %v1366_v35 }
0x13b5   :  { %1367 = vrcp.f32 %v994_v36 }
0x13c2   :  { %v1368_v37 = vpop.eup %1367 }
0x13c3   :  { %v998_v8 = vmul.f32 %v1368_v37, %v903_v11 }
0x1423   :  { %v1001_v38 = vpop.permute.xlu0 %1000 }
0x1424   :  { %v1003_v39 = vmul.f32 %v1368_v37, %v1001_v38 }
0x1426   :  { %1005 = vrot.lane.b32.xlu1 %v1003_v39, %s1424_s3 }
0x142a   :  { %389 = vrot.lane.b32.xlu1 %v1559_v48, %s1423_s21  ;;  %s1430_s21 = smov [#allocation6]  }
0x142e   :  { %701 = vrot.lane.b32.xlu1 %v1611_v50, %s1424_s3  ;;  %s1151_s3 = sshll.u32 %s1430_s21, 4  ;;  %s1152_s3 = int_to_ptr.vmem [resolvable:$true] %s1151_s3 }
0x142f   :  { %p1382_p1 = scmp.lt.s32.totalorder %s1152_s3, %s1152_s3 }
0x1432   :  { %911 = vrot.lane.b32.xlu1 %v909_v26, %s1427_s0 }
0x1498   :  { %v1006_v9 = vpop.permute.xlu1 %1005 }
0x1499   :  { %v1008_v40 = vadd.f32 %v1006_v9, %v998_v8 }
0x149b   :  { %1369 = vtanh.f32 %v1008_v40 }
0x149c   :  { %v390_v41 = vpop.permute.xlu1 %389 }
0x149d   :  { %393 = vst.msk [vmem:[#allocation2] sm:$0xff] %vm392_vm3, %v390_v41 }
0x14a0   :  { %v702_v44 = vpop.permute.xlu1 %701 }
0x14a4   :  { %v912_v47 = vpop.permute.xlu1 %911 }
0x14a8   :  { %v1370_v42 = vpop.eup %1369 }
0x14a9   :  { %1011 = vrot.lane.b32.xlu0 %v1370_v42, %s1425_s22 }
0x14ad   :  { %494 = vrot.lane.b32.xlu0 %v1573_v4, %s1428_s11 }
0x14b1   :  { %806 = vrot.lane.b32.xlu0 %v804_v3, %s1425_s22  ;;  %s1377_s22 = scalar_lea.vmem %s1152_s3, 32 }
0x14b2   :  { %p1378_p0 = scmp.ne.s32.totalorder %s1152_s3, %s1377_s22  ;;  %p1383_p2 = scmp.lt.s32.totalorder %s1377_s22, %s1377_s22 }
0x14b4   :  { %p1384_p3 = por %p1383_p2, %p1382_p1 }
0x14b6   :  { %p1385_p4 = pnand %p1384_p3, %p1378_p0 }
0x151b   :  { %v1012_v48 = vpop.permute.xlu0 %1011 }
0x151c   :  { %v1014_v43 = vmul.f32 %v1368_v37, %v1012_v48 }
0x151e   :  { %1016 = vrot.lane.b32.xlu0 %v1014_v43, %s1429_s12 }
0x151f   :  { %v495_v45 = vpop.permute.xlu0 %494 }
0x1520   :  { %498 = vst.msk [vmem:[#allocation2] sm:$0xff] %vm497_vm4, %v495_v45 }
0x1521   :  { %599 = vst.msk [vmem:[#allocation2] sm:$0xff] %vm598_vm5, %v1597_v29 }
0x1522   :  { %705 = vst.msk [vmem:[#allocation2] sm:$0xff] %vm704_vm6, %v702_v44 }
0x1523   :  { %v807_v46 = vpop.permute.xlu0 %806 }
0x1524   :  { %810 = vst.msk [vmem:[#allocation2] sm:$0xff] %vm809_vm7, %v807_v46 }
0x1525   :  { %915 = vst.msk [vmem:[#allocation2] sm:$0xff] %vm914_vm8, %v912_v47 }
0x1590   :  { %v1017_v4 = vpop.permute.xlu0 %1016 }
0x1591   :  { %1020 = vst.msk [vmem:[#allocation2] sm:$0xff] %vm1019_vm9, %v1017_v4 }
0x1598   :  { %v1021_v50 = vld [vmem:[#allocation2] sm:$0xff] }
0x1599   :  { %v1024_v29 = vmul.f32 %v1023_v49, %v1021_v50 }
0x159b   :  { %v1032_v52 = vadd.f32 %v1196_v51, %v1024_v29 }
0x159d   :  { %1371 = vtanh.f32 %v1032_v52 }
0x15aa   :  { %v1372_v53 = vpop.eup %1371 }
0x15ab   :  { %v1035_v54 = vsel %vm1034_vm10, %v1372_v53, -inf }
0x15ac   :  { %1036 = vmax.xlane.f32.xlu1 %v1035_v54 }
0x1635   :  { %v1037_v55 = vpop.xlane.xlu1 %1036 }
0x1636   :  { %v1038_v56 = vsub.f32 %v1372_v53, %v1037_v55 }
0x1638   :  { %v1039_v57 = vmul.f32 1.442695, %v1038_v56 }
0x163a   :  { %1373 = vpow2.f32 %v1039_v57 }
0x1647   :  { %v1374_v58 = vpop.eup %1373 }
0x1648   :  { %v1041_v59 = vsel %vm1034_vm10, %v1374_v58, 0.0 }
0x1649   :  { %1042 = vadd.xlane.f32.xlu0 %v1041_v59 }
0x16d2   :  { %v1043_v63 = vpop.xlane.xlu0 %1042 }
0x16d3   :  { %1375 = vrcp.f32 %v1043_v63 }
0x16e0   :  { %v1376_v0 = vpop.eup %1375 }
0x16e1   :  { %v1045_v1 = vmul.f32 %v1376_v0, %v1374_v58 }
0x16e3   :  { %v1046_v2 = vmul.f32 %v1045_v1, %v1021_v50  ;;  %1134 = vst.msk [vmem:[#allocation6] sm:$0x3] %vm1133_vm11, %v1045_v1 }
0x16e5   :  { %1292 = vmatmul.mubr.msk.f32.vlgmr.msra.gmra.mxu0 %vm1034_vm10, %v1046_v2 }
0x16e6   :  { %1388 = shalt.err (!%p1385_p4)
}
0x16e7   :  { %1154 = dma.vmem_to_hbm [thread:$0]  %s1152_s3, 32, %s1689_s9, [#allocation7]   ;;  %v1197_v6 = vld [vmem:[%s1687_s7] ss:$0 sm:$0xff]  ;;  %vm1131_vm12 = vcmask 9216  }
0x16e8   :  { %s1431_s26 = smov [#allocation4]  }
0x16e9   :  { %s1141_s27 = sshll.u32 %s1431_s26, 4  ;;  %s1142_s27 = int_to_ptr.vmem [resolvable:$true] %s1141_s27 }
0x16ea   :  { %s1397_s28 = scalar_lea.vmem %s1142_s27, 32  ;;  %p1402_p6 = scmp.lt.s32.totalorder %s1142_s27, %s1142_s27 }
0x16eb   :  { %p1398_p5 = scmp.ne.s32.totalorder %s1142_s27, %s1397_s28  ;;  %p1403_p7 = scmp.lt.s32.totalorder %s1397_s28, %s1397_s28 }
0x16ed   :  { %p1404_p8 = por %p1403_p7, %p1402_p6 }
0x16ef   :  { %p1405_p9 = pnand %p1404_p8, %p1398_p5 }
0x17a5   :  { %v1127_v3 = vpop.f32.mrf.mxu0 }
0x17a6   :  { %v1128_v7 = vadd.f32 %v1197_v6, %v1127_v3 }
0x17a7   :  { %v1293_v10 = vpop.f32.mrf.mxu0 }
0x17a8   :  { %1132 = vst.msk [vmem:[#allocation4] sm:$0x3] %vm1131_vm12, %v1128_v7 }
0x17a9   :  { %1408 = shalt.err (!%p1405_p9)
}
0x17aa   :  { %1144 = dma.vmem_to_hbm [thread:$0]  %s1142_s27, 32, %s1688_s8, [#allocation5]  }
0x17ab   :  { %1417 = dma.done.wait [#allocation5], 32  }
0x17ac   :  { %1418 = vsyncadd [#allocation5], 4294967264 }
0x17ad   :  { %1419 = dma.done.wait [#allocation7], 32  }
0x17ae   :  { %1420 = vsyncadd [#allocation7], 4294967264 }
0x17af   :  { %1161 = vsyncpa [#allocation5], 1 }
0x17b0   :  { %1162 = vsyncpa [#allocation7], 1 }

</bundles_post_ra>
